<compile_context>
chip_gen: v7x
topology: tpu7x:2x2x1
jax: 0.10.0
libtpu: 0.0.40
codegen_flags: <defaults>
</compile_context>

<pallas_src>
import numpy as np
import jax
import jax.numpy as jnp
from jax import lax
from jax.experimental import pallas as pl
from jax.experimental.pallas import tpu as pltpu


def _round_up(x, m):
    return ((x + m - 1) // m) * m


def _pick_row_tile(M, target=512):
    """Largest multiple-of-8 divisor of M up to `target` (>=2 grid steps when
    M is big enough, so both v7x TensorCores get work)."""
    target = min(target, max(8, M // 2))
    best = 8 if M % 8 == 0 else M
    for c in range(8, target + 1, 8):
        if M % c == 0:
            best = c
    return best


def _pick_time_chunk(T, target=4):
    """Largest divisor of T up to `target` timesteps per grid step."""
    for c in range(min(target, T), 0, -1):
        if T % c == 0:
            return c
    return 1


# ---------------------------------------------------------------------------
# Kernel 1: hoisted input projection  gates_x = x @ W_ih + b   (parallel, M-tiled)
# ---------------------------------------------------------------------------
def _in_proj_kernel(x_ref, wih_ref, b_ref, gx_ref):
    acc = jnp.dot(x_ref[...], wih_ref[...], preferred_element_type=jnp.float32)
    gx_ref[...] = (acc + b_ref[...]).astype(gx_ref.dtype)


def input_projection(x2d, wih_bf16, b_f32):
    M, E = x2d.shape
    G = wih_bf16.shape[1]
    tm = _pick_row_tile(M)
    grid_spec = pltpu.PrefetchScalarGridSpec(
        num_scalar_prefetch=0,
        grid=(M // tm,),
        in_specs=[
            pl.BlockSpec((tm, E), lambda i: (i, 0)),
            pl.BlockSpec((E, G), lambda i: (0, 0)),      # resident weights
            pl.BlockSpec((1, G), lambda i: (0, 0)),      # resident bias
        ],
        out_specs=pl.BlockSpec((tm, G), lambda i: (i, 0)),
    )
    return pl.pallas_call(
        _in_proj_kernel,
        out_shape=jax.ShapeDtypeStruct((M, G), jnp.bfloat16),
        grid_spec=grid_spec,
        compiler_params=pltpu.CompilerParams(
            dimension_semantics=("parallel",)),
    )(x2d, wih_bf16, b_f32)


# ---------------------------------------------------------------------------
# Kernel 2: sequential LSTM recurrence, streamed over time chunks
# ---------------------------------------------------------------------------
def _lstm_recurrence_kernel(gx_ref, whh_ref, out_ref, hn_ref, cn_ref,
                            h_scr, c_scr):
    t_blk = pl.program_id(0)
    Tc = gx_ref.shape[0]
    Hp = h_scr.shape[-1]

    @pl.when(t_blk == 0)
    def _():
        # nn.LSTM with hidden=None starts from zeros.
        h_scr[...] = jnp.zeros_like(h_scr)
        c_scr[...] = jnp.zeros_like(c_scr)

    def step(t, carry):
        h_prev, c_prev = carry
        # Only the recurrent matmul stays on the serialized critical path
        # (bf16 operands, f32 accumulate).
        gates = gx_ref[t].astype(jnp.float32) + jnp.dot(
            h_prev.astype(jnp.bfloat16), whh_ref[...],
            preferred_element_type=jnp.float32)
        # Lane-aligned gate slices (PyTorch order i, f, g, o).
        # TODO(synk): at production Hp, apply nonlinearities per 128/256-lane
        # chunk instead of materializing the full [Bp, 4Hp] gates tensor.
        i_g = jax.nn.sigmoid(gates[:, 0 * Hp:1 * Hp])
        f_g = jax.nn.sigmoid(gates[:, 1 * Hp:2 * Hp])
        g_g = jnp.tanh(gates[:, 2 * Hp:3 * Hp])
        o_g = jax.nn.sigmoid(gates[:, 3 * Hp:4 * Hp])
        c_new = f_g * c_prev + i_g * g_g
        h_new = o_g * jnp.tanh(c_new)
        out_ref[t] = h_new.astype(out_ref.dtype)        # lane-dense store
        return (h_new, c_new)

    # h/c carried as loop VALUES within the chunk (no per-step VMEM round trip).
    h_t, c_t = lax.fori_loop(0, Tc, step, (h_scr[...], c_scr[...]),
                             unroll=(Tc <= 8))
    h_scr[...] = h_t
    c_scr[...] = c_t

    @pl.when(t_blk == pl.num_programs(0) - 1)
    def _():
        # final state written exactly once
        hn_ref[...] = h_t
        cn_ref[...] = c_t


def lstm_recurrence(gx_tm, whh_bf16):
    T, Bp, G = gx_tm.shape
    Hp = whh_bf16.shape[0]
    Tc = _pick_time_chunk(T)
    grid_spec = pltpu.PrefetchScalarGridSpec(
        num_scalar_prefetch=0,
        grid=(T // Tc,),
        in_specs=[
            pl.BlockSpec((Tc, Bp, G), lambda t: (t, 0, 0)),   # streamed gx
            pl.BlockSpec((Hp, G), lambda t: (0, 0)),          # resident W_hh
        ],
        out_specs=[
            pl.BlockSpec((Tc, Bp, Hp), lambda t: (t, 0, 0)),  # streamed out
            pl.BlockSpec((Bp, Hp), lambda t: (0, 0)),         # h_n
            pl.BlockSpec((Bp, Hp), lambda t: (0, 0)),         # c_n
        ],
        scratch_shapes=[
            pltpu.VMEM((Bp, Hp), jnp.float32),                # h carry
            pltpu.VMEM((Bp, Hp), jnp.float32),                # c carry
        ],
    )
    out_shape = (
        jax.ShapeDtypeStruct((T, Bp, Hp), jnp.bfloat16),
        jax.ShapeDtypeStruct((Bp, Hp), jnp.float32),
        jax.ShapeDtypeStruct((Bp, Hp), jnp.float32),
    )
    return pl.pallas_call(
        _lstm_recurrence_kernel,
        out_shape=out_shape,
        grid_spec=grid_spec,
        compiler_params=pltpu.CompilerParams(
            dimension_semantics=("arbitrary",)),              # sequential
    )(gx_tm, whh_bf16)


# ---------------------------------------------------------------------------
# Kernel 3: output projection + stable softmax + greedy argmax (parallel, M-tiled)
# ---------------------------------------------------------------------------
def _out_proj_softmax_kernel(h_ref, wout_ref, bout_ref, sm_ref, arg_ref):
    logits = (jnp.dot(h_ref[...], wout_ref[...],
                      preferred_element_type=jnp.float32)
              + bout_ref[...])                                # [tm, Vp] f32
    m = jnp.max(logits, axis=-1, keepdims=True)
    e = jnp.exp(logits - m)
    denom = jnp.sum(e, axis=-1, keepdims=True)
    sm_ref[...] = (e / denom).astype(sm_ref.dtype)            # exact normalize
    # top-1 greedy symbols (first index attaining the max, like np.argmax)
    col = lax.broadcasted_iota(jnp.int32, logits.shape, 1)
    cand = jnp.where(logits == m, col, jnp.int32(logits.shape[-1]))
    arg_ref[...] = jnp.min(cand, axis=-1, keepdims=True)


def output_projection_softmax(h2d, wout_bf16, bout_f32):
    M, Hp = h2d.shape
    Vp = wout_bf16.shape[1]
    tm = _pick_row_tile(M)
    grid_spec = pltpu.PrefetchScalarGridSpec(
        num_scalar_prefetch=0,
        grid=(M // tm,),
        in_specs=[
            pl.BlockSpec((tm, Hp), lambda i: (i, 0)),
            pl.BlockSpec((Hp, Vp), lambda i: (0, 0)),         # resident W_out
            pl.BlockSpec((1, Vp), lambda i: (0, 0)),
        ],
        out_specs=[
            pl.BlockSpec((tm, Vp), lambda i: (i, 0)),
            pl.BlockSpec((tm, 1), lambda i: (i, 0)),
        ],
    )
    out_shape = (
        jax.ShapeDtypeStruct((M, Vp), jnp.float32),
        jax.ShapeDtypeStruct((M, 1), jnp.int32),
    )
    return pl.pallas_call(
        _out_proj_softmax_kernel,
        out_shape=out_shape,
        grid_spec=grid_spec,
        compiler_params=pltpu.CompilerParams(
            dimension_semantics=("parallel",)),
    )(h2d, wout_bf16, bout_f32)


# ---------------------------------------------------------------------------
# Parameters
# ---------------------------------------------------------------------------
def init_params(key, vocab_size, embed_dim, hidden_dim):
    ks = jax.random.split(key, 6)
    s = 0.1
    return dict(
        emb=jax.random.normal(ks[0], (vocab_size, embed_dim), jnp.float32) * s,
        wih=jax.random.normal(ks[1], (embed_dim, 4 * hidden_dim), jnp.float32) * s,
        whh=jax.random.normal(ks[2], (hidden_dim, 4 * hidden_dim), jnp.float32) * s,
        b=jax.random.normal(ks[3], (4 * hidden_dim,), jnp.float32) * s,  # b_ih+b_hh
        wout=jax.random.normal(ks[4], (hidden_dim, vocab_size), jnp.float32) * s,
        bout=jax.random.normal(ks[5], (vocab_size,), jnp.float32) * s,
    )


def prepare_decoder_params(params):
    """One-time weight padding / layout / dtype prep (hoisted out of forward).
    Zero padding keeps padded Hp columns of h/c exactly zero; padded vocab
    bias = -1e30 is softmax-neutral."""
    V, E = params['emb'].shape
    H = params['whh'].shape[0]
    Hp = _round_up(H, 128)
    Vp = _round_up(V, 128)

    def pad_gates(w):
        # [K, 4H] (PyTorch gate order i,f,g,o) -> [K, 4*Hp], lane-aligned gates
        K = w.shape[0]
        wg = w.reshape(K, 4, H)
        wg = jnp.pad(wg, ((0, 0), (0, 0), (0, Hp - H)))
        return wg.reshape(K, 4 * Hp)

    wih_p = pad_gates(params['wih']).astype(jnp.bfloat16)               # [E, 4Hp]
    whh_p = jnp.pad(pad_gates(params['whh']),
                    ((0, Hp - H), (0, 0))).astype(jnp.bfloat16)         # [Hp, 4Hp]
    b_p = pad_gates(params['b'].reshape(1, -1)).astype(jnp.float32)     # [1, 4Hp]
    wout_p = jnp.pad(params['wout'],
                     ((0, Hp - H), (0, Vp - V))).astype(jnp.bfloat16)   # [Hp, Vp]
    bout_p = jnp.pad(params['bout'].reshape(1, V), ((0, 0), (0, Vp - V)),
                     constant_values=-1e30).astype(jnp.float32)         # [1, Vp]
    weights = dict(emb=params['emb'], wih=wih_p, whh=whh_p, b=b_p,
                   wout=wout_p, bout=bout_p)
    dims = dict(E=E, H=H, V=V, Hp=Hp, Vp=Vp)
    return weights, dims


# ---------------------------------------------------------------------------
# Forward pass (mirrors Decoder.forward with defaults)
# ---------------------------------------------------------------------------
def decoder_forward(weights, dims, token_ids, eos_id):
    """Mirrors Decoder.forward(inputs=token_ids, encoder_hidden=None,
    use_attention=False, use_copy=False).
    Returns (decoder_outputs, decoder_hidden, ret_dict)."""
    B, T = token_ids.shape
    E, H, V = dims['E'], dims['H'], dims['V']
    Hp, Vp = dims['Hp'], dims['Vp']
    Bp = _round_up(B, 8)

    # glue: embedding lookup + input dropout (p=0 -> identity), time-major,
    # batch padded to 8 sublanes (padded batch rows are wasted compute,
    # sliced off at the end).
    embedded = jnp.take(weights['emb'], token_ids, axis=0)              # [B,T,E]
    x_tm = jnp.transpose(embedded, (1, 0, 2))                           # [T,B,E]
    x_tm = jnp.pad(x_tm, ((0, 0), (0, Bp - B), (0, 0))).astype(jnp.bfloat16)
    # TODO(synk): when E << 128, W_ih could be folded into the embedding table
    # offline (emb @ W_ih -> [V, 4Hp]), removing K1 entirely.

    # K1: hoisted input projection over all T*Bp rows (pipelined M tiles).
    gx = input_projection(x_tm.reshape(T * Bp, E), weights['wih'], weights['b'])
    gx_tm = gx.reshape(T, Bp, 4 * Hp)                                   # bf16

    # K2: sequential recurrence, streamed over time chunks.
    lstm_out, h_n, c_n = lstm_recurrence(gx_tm, weights['whh'])

    # K3: batched output projection + stable softmax + greedy argmax.
    sm2d, arg2d = output_projection_softmax(
        lstm_out.reshape(T * Bp, Hp), weights['wout'], weights['bout'])
    predicted_softmax = jnp.transpose(
        sm2d.reshape(T, Bp, Vp), (1, 0, 2))[:B, :, :V]                  # [B,T,V]
    symbols_bt = jnp.transpose(arg2d.reshape(T, Bp), (1, 0))[:B, :]     # [B,T]

    decoder_hidden = (h_n[None, :B, :H], c_n[None, :B, :H])             # (1,B,H)

    # Greedy / bookkeeping glue (matches the Python loop in Decoder.forward);
    # argmax already computed on device, one host transfer each.
    decoder_outputs = []
    sequence_symbols = []
    lengths = np.array([T] * B)
    sm_host = np.asarray(predicted_softmax)
    sym_host = np.asarray(symbols_bt)
    for di in range(T):
        decoder_outputs.append(jnp.asarray(sm_host[:, di, :]))          # [B, V]
        symbols = sym_host[:, di].reshape(B, 1)                         # topk(1)[1]
        sequence_symbols.append(jnp.asarray(symbols))
        eos_batches = (symbols == eos_id).reshape(-1)
        update_idx = ((lengths > di) & eos_batches) != 0
        lengths[update_idx] = len(sequence_symbols)

    ret_dict = {'sequence': sequence_symbols, 'length': lengths.tolist()}
    return decoder_outputs, decoder_hidden, ret_dict


# ---------------------------------------------------------------------------
# Pure-JAX f32 reference (lax.scan LSTM + softmax) for correctness checking
# ---------------------------------------------------------------------------
def reference_forward(params, token_ids):
    B, T = token_ids.shape
    H = params['whh'].shape[0]
    emb = jnp.take(params['emb'], token_ids, axis=0)                    # [B,T,E]
    x_tm = jnp.transpose(emb, (1, 0, 2)).astype(jnp.float32)            # [T,B,E]

    def cell(carry, x_t):
        h, c = carry
        gates = x_t @ params['wih'] + h @ params['whh'] + params['b']
        i = jax.nn.sigmoid(gates[:, 0 * H:1 * H])
        f = jax.nn.sigmoid(gates[:, 1 * H:2 * H])
        g = jnp.tanh(gates[:, 2 * H:3 * H])
        o = jax.nn.sigmoid(gates[:, 3 * H:4 * H])
        c = f * c + i * g
        h = o * jnp.tanh(c)
        return (h, c), h

    init = (jnp.zeros((B, H), jnp.float32), jnp.zeros((B, H), jnp.float32))
    (hT, cT), hs = lax.scan(cell, init, x_tm)                           # [T,B,H]
    logits = hs @ params['wout'] + params['bout']
    sm = jax.nn.softmax(logits, axis=-1)                                # [T,B,V]
    return jnp.transpose(sm, (1, 0, 2)), hT, cT


if __name__ == "__main__":
    B, T = 2, 8          # batch, decoder length
    E, H = 32, 32        # embed_dim, hidden_dim
    V = 64               # vocab (num_embeddings)
    SOS_ID, EOS_ID = 1, 2

    key = jax.random.PRNGKey(0)
    k_param, k_tok = jax.random.split(key)
    params = init_params(k_param, V, E, H)
    token_ids = jax.random.randint(k_tok, (B, T), 0, V, dtype=jnp.int32)

    weights, dims = prepare_decoder_params(params)     # one-time prep (hoisted)
    decoder_outputs, decoder_hidden, ret_dict = decoder_forward(
        weights, dims, token_ids, EOS_ID)
    jax.block_until_ready(decoder_hidden)
    jax.block_until_ready(decoder_outputs)

    # Correctness vs. pure-JAX f32 reference (kernels use bf16 MXU operands).
    sm_ref, h_ref, c_ref = reference_forward(params, token_ids)
    sm_kernel = jnp.stack(decoder_outputs, axis=1)                      # [B,T,V]
    np.testing.assert_allclose(np.asarray(sm_kernel), np.asarray(sm_ref),
                               atol=5e-3, rtol=0)
    np.testing.assert_allclose(np.asarray(decoder_hidden[0][0]),
                               np.asarray(h_ref), atol=1e-2, rtol=0)
    np.testing.assert_allclose(np.asarray(decoder_hidden[1][0]),
                               np.asarray(c_ref), atol=1e-2, rtol=0)

    # Softmax rows sum to ~1 (exact normalization, no approx reciprocal).
    row_sums = np.asarray(jnp.sum(sm_kernel, axis=-1))
    assert np.all(np.abs(row_sums - 1.0) < 1e-4), row_sums

    # In-kernel greedy argmax agrees with argmax of the kernel's own softmax.
    sym_kernel = np.concatenate([np.asarray(s) for s in ret_dict['sequence']],
                                axis=1)
    assert np.array_equal(sym_kernel,
                          np.argmax(np.asarray(sm_kernel), axis=-1))

    # Shapes / bookkeeping match the module.
    assert decoder_outputs[0].shape == (B, V)
    assert decoder_hidden[0].shape == (1, B, H)
    assert len(ret_dict['sequence']) == T
    assert len(ret_dict['length']) == B

    print("KERNEL_OK")
</pallas_src>

<mosaic_0001>
module attributes {stable_mosaic.version = 11 : i64} {
  func.func @_in_proj_kernel(%arg0: i32, %arg1: memref<32x32xbf16, #tpu.memory_space<vmem>>, %arg2: memref<32x512xbf16, #tpu.memory_space<vmem>>, %arg3: memref<1x512xf32, #tpu.memory_space<vmem>>, %arg4: memref<32x512xbf16, #tpu.memory_space<vmem>>) attributes {dimension_semantics = [#tpu.dimension_semantics<parallel>], iteration_bounds = array<i64: 2>, scalar_prefetch = 0 : i64, scratch_operands = 0 : i64, tpu.core_type = #tpu.core_type<tc>, window_params = [{transform_indices = @transform_0, window_bounds = array<i64: 32, 32>}, {pipeline_mode = #tpu.pipeline_mode<synchronous>, transform_indices = @transform_1, window_bounds = array<i64: 32, 512>}, {pipeline_mode = #tpu.pipeline_mode<synchronous>, transform_indices = @transform_2, window_bounds = array<i64: 1, 512>}, {transform_indices = @transform_3, window_bounds = array<i64: 32, 512>}]} {
    %c0 = arith.constant 0 : index
    %c0_0 = arith.constant 0 : index
    %0 = vector.load %arg1[%c0, %c0_0] : memref<32x32xbf16, #tpu.memory_space<vmem>>, vector<32x32xbf16>
    %c0_1 = arith.constant 0 : index
    %c0_2 = arith.constant 0 : index
    %1 = vector.load %arg2[%c0_1, %c0_2] : memref<32x512xbf16, #tpu.memory_space<vmem>>, vector<32x512xbf16>
    %cst = arith.constant dense<0.000000e+00> : vector<32x512xf32>
    %2 = tpu.matmul %0, %1, %cst {dimension_numbers = #tpu.dot_dimension_numbers<[1], [0], [0], [1], [0, 0, 1, 1], [], []>} : vector<32x32xbf16>, vector<32x512xbf16>, vector<32x512xf32> -> vector<32x512xf32>
    %c0_3 = arith.constant 0 : index
    %c0_4 = arith.constant 0 : index
    %3 = vector.load %arg3[%c0_3, %c0_4] : memref<1x512xf32, #tpu.memory_space<vmem>>, vector<1x512xf32>
    %4 = vector.broadcast %3 : vector<1x512xf32> to vector<32x512xf32>
    %5 = arith.addf %2, %4 : vector<32x512xf32>
    %6 = arith.truncf %5 : vector<32x512xf32> to vector<32x512xbf16>
    %c0_5 = arith.constant 0 : index
    %c0_6 = arith.constant 0 : index
    %7 = vector.load %arg4[%c0_5, %c0_6] : memref<32x512xbf16, #tpu.memory_space<vmem>>, vector<32x512xbf16>
    tpu.vector_store %arg4[%c0_5, %c0_6], %6 {strides = array<i32>} : memref<32x512xbf16, #tpu.memory_space<vmem>>, vector<32x512xbf16>,
    return
  }
  func.func @transform_0(%arg0: i32) -> (i32, i32) {
    %c0_i32 = arith.constant 0 : i32
    %c0_i32_0 = arith.constant 0 : i32
    return %arg0, %c0_i32 : i32, i32
  }
  func.func @transform_1(%arg0: i32) -> (i32, i32) {
    %c0_i32 = arith.constant 0 : i32
    %c0_i32_0 = arith.constant 0 : i32
    %c0_i32_1 = arith.constant 0 : i32
    return %c0_i32, %c0_i32_0 : i32, i32
  }
  func.func @transform_2(%arg0: i32) -> (i32, i32) {
    %c0_i32 = arith.constant 0 : i32
    %c0_i32_0 = arith.constant 0 : i32
    %c0_i32_1 = arith.constant 0 : i32
    return %c0_i32, %c0_i32_0 : i32, i32
  }
  func.func @transform_3(%arg0: i32) -> (i32, i32) {
    %c0_i32 = arith.constant 0 : i32
    %c0_i32_0 = arith.constant 0 : i32
    return %arg0, %c0_i32 : i32, i32
  }
}

</mosaic_0001>

<bundles_post_ra>
// kernel: tpu_custom_call.1
= control target key start
LH: loop header
LB: loop body
LE: loop exit
PB: predicated region body
PF: predicated region fallthrough
CT: control target
= control target key end

     0   :  { %8 = vsyncpa [#allocation3], 0  ;;  %s924_s0 = inlined_call_operand.vmem [shape: bf16[64,32], index: 0, kind: input, shape index: {}]   ;;  %s925_s1 = inlined_call_operand.hbm [shape: bf16[32,512], index: 1, kind: input, shape index: {}]   ;;  %s926_s2 = inlined_call_operand.vmem [shape: f32[1,512], index: 2, kind: input, shape index: {}]   ;;  %s927_s3 = inlined_call_operand.hbm [shape: bf16[64,512], index: 3, kind: output, shape index: {}]  }
   0x1   :  { %9 = vsyncpa [#allocation4], 0 }
   0x2   :  { %11 = vsyncpa [#allocation4 + $0x1], 0  ;;  %s769_s12 = smov 0   ;;  %s771_s13 = smov 0  }
   0x3   :  { %s773_s14 = smov 0   ;;  %s775_s15 = smov 0  }
   0x4 LB: > { %s790_s16 = sadd.s32 4294967295, %s740_s15   ;;  %s530_s17 = sadd.s32 4294967294, %s740_s15   ;;  %s740_s15 = sphi %s775_s15, %s943_s15   ;;  %s736_s14 = sphi %s773_s14, %s942_s14   ;;  %s732_s13 = sphi %s771_s13, %s941_s13   ;;  %s728_s12 = sphi %s769_s12, %s940_s12  }
   0x5   : > { %s794_s18 = sadd.s32 1, %s740_s15   ;;  %s92_s19 = sadd.s32 1, %s736_s14 }
   0x6   : > { %s89_s20 = ssub.s32 %s740_s15, %s794_s18  ;;  %p102_p0 = scmp.ne.s32.totalorder %s736_s14, %s732_s13 }
   0x7   : > { %p90_p1 = scmp.eq.s32.totalorder %s89_s20, 0  ;;  %p103_p2 = scmp.eq.s32.totalorder %s790_s16, 1 }
   0x8   : > { %p108_p3 = scmp.ne.s32.totalorder %s732_s13, %s728_s12  ;;  %p109_p4 = scmp.eq.s32.totalorder %s530_s17, 1 }
   0x9   : > { %s805_s21 = scalar_select %p90_p1, %s736_s14, %s92_s19  }
   0xa   : > { %p807_p5 = por %p103_p2, %p102_p0  ;;  %p811_p6 = por %p109_p4, %p108_p3 }
   0xb   : > { %p531_p7 = scmp.ge.s32.totalorder %s740_s15, 1  ;;  %p116_p8 = scmp.lt.s32.totalorder %s740_s15, 3 }
   0xc   : > { %s931_s22 = scalar_select %p807_p5, 1, 0 }
   0xd   : > { %s932_s23 = scalar_select %p811_p6, 1, 0 }
   0xe   : > { %p928_p9 = scmp.eq.s32.totalorder %s790_s16, 0  ;;  %p818_p10 = pnand %p531_p7, %p116_p8 }
   0xf   : > { %s742_s25 = smov [#allocation2]   ;;  %s646_s30 = scalar_lea.hbm %s925_s1, 1024 }
  0x10   : > { %s933_s24 = scalar_select %p818_p10, 1, 0 }
  0x11   : > { %s128_s26 = sshll.u32 %s742_s25, 4  ;;  %p583_p11 = pneg %p818_p10  ;;  %s129_s26 = int_to_ptr.vmem [resolvable:$true] %s128_s26 }
  0x12   : > { %p647_p13 = scmp.ne.s32.totalorder %s925_s1, %s646_s30  ;;  %p653_p3 = scmp.lt.u32.totalorder %s646_s30, %s925_s1 }
  0x13   : > { %p826_p12 = pnand %p928_p9, %p583_p11 }
  0x15   : > { %p648_p0 = pneg %p826_p12 }
  0x17   : > { %p649_p1 = pnand %p648_p0, %p647_p13 }
  0x19   : > { %p650_p2 = pneg %p649_p1 }
  0x1b   : > { %p655_p4 = pnand %p653_p3, %p650_p2 }
  0x1d   : > { %658 = shalt.err (!%p655_p4)
}
  0x1e   : > { %s659_s8 = scalar_lea.vmem %s129_s26, 1024  ;;  %p667_p9 = scmp.lt.s32.totalorder %s129_s26, %s129_s26 }
  0x1f   : > { %p660_p7 = scmp.ne.s32.totalorder %s129_s26, %s659_s8  ;;  %p668_p6 = scmp.lt.s32.totalorder %s659_s8, %s659_s8 }
  0x21   : > { %p662_p8 = pnand %p660_p7, %p648_p0  ;;  %p669_p5 = por %p668_p6, %p667_p9 }
  0x23   : > { %p663_p11 = pneg %p662_p8 }
  0x25   : > { %p670_p10 = pnand %p669_p5, %p663_p11 }
  0x27   : > { %673 = shalt.err (!%p670_p10)
}
  0x28   : > { %s743_s9 = smov 256   ;;  %s744_s10 = smov 16  }
  0x29   : > { %586 = dma.hbm_to_vmem [thread:$0]  (!%p826_p12), %s925_s1, 1024, %s129_s26, [#allocation3], %s743_s9, %s743_s9, %s744_s10  }
  0x2a   : > { %p935_p13 = scmp.ne.s32.totalorder %s933_s24, 0 }
  0x2b   : > { %p936_p1 = scmp.eq.s32.totalorder (!%p935_p13), %s790_s16, 0 }
  0x2c   : > { %156 = sbr.rel (%p935_p13) target bundleno = 304 (0x130), region = 32 }
  0x33   : > { %719 = dma.done.wait (%p936_p1), [#allocation3], 1024   ;;  %p937_p0 = pmov %p936_p1 }
  0x34   : > { %s537_s19 = sshll.u32 %s790_s16, 2  ;;  %v745_v0 = vmov 0   ;;  %v632_v1 = vld [vmem:[#allocation2 + $0x4] ss:$16 sps:$4 sm:$0xff]   ;;  %v634_v2 = vld [vmem:[#allocation2 + $0xc] ss:$16 sps:$4 sm:$0xff]   ;;  %v202_v11 = vlaneseq }
  0x35   : > { %721 = vsyncadd (%p937_p0), [#allocation3], 4294966272  ;;  %311 = vmatprep.mubr.bf16.mxu0 %v745_v0  ;;  %364 = vmatprep.mubr.bf16.mxu1 %v745_v0  ;;  %p181_p5 = scmp.lt.s32.totalorder %s537_s19, 7  ;;  %v636_v3 = vld [vmem:[#allocation2] ss:$16 sps:$4 sm:$0xff]   ;;  %vm272_vm0 = vcmask 261120  }
  0x36   : > { %279 = vmatprep.subr.bf16.mxu0 %v632_v1  ;;  %v637_v4 = vld [vmem:[#allocation2 + $0x8] ss:$16 sps:$4 sm:$0xff]   ;;  %332 = vmatprep.subr.bf16.mxu1 %v634_v2  ;;  %v638_v5 = vld [vmem:[#allocation2 + $0x24] ss:$16 sps:$4 sm:$0xff]   ;;  %v640_v6 = vld [vmem:[#allocation2 + $0x2c] ss:$16 sps:$4 sm:$0xff]  }
  0x37   : > { %s945_s19 = smov (!%p181_p5, %s537_s19), 7  ;;  %280 = vmatpush1.bf16.msra.mxu0 %v636_v3  ;;  %333 = vmatpush1.bf16.msra.mxu1 %v637_v4  ;;  %v642_v7 = vld [vmem:[#allocation2 + $0x20] ss:$16 sps:$4 sm:$0xff]   ;;  %v643_v8 = vld [vmem:[#allocation2 + $0x28] ss:$16 sps:$4 sm:$0xff]   ;;  %v203_v12 = vshrl.u32 %v202_v11, 7 }
  0x38   : > { %s538_s20 = sshll.u32 %s945_s19, 2  ;;  %281 = vmatprep.subr.bf16.mxu0 %v638_v5  ;;  %334 = vmatprep.subr.bf16.mxu1 %v640_v6  ;;  %v200_v15 = vld [vmem:[%s926_s2] sm:$0xf]  ;;  %s177_s29 = sand.u32 1, %s732_s13  }
  0x39   : > { %s184_s26 = scalar_lea.vmem %s924_s0, %s538_s20  ;;  %v204_v13 = vsub.s32 0, %v203_v12  ;;  %v212_v14 = vsub.s32 2, %v203_v12  ;;  %v208_v16 = vsub.s32 1, %v203_v12  ;;  %v216_v17 = vsub.s32 3, %v203_v12  ;;  %s536_s30 = sshll.u32 %s177_s29, 6 }
  0x3a   : > { %v644_v9 = vld [vmem:[%s184_s26] sm:$0xff]   ;;  %v645_v10 = vld [vmem:[%s184_s26 + $0x8] sm:$0xff]   ;;  %s862_s4 = scalar_lea.vmem [#allocation5], %s536_s30  ;;  %s576_s6 = sshll.u32 %s790_s16, 10 }
  0x3b   : > { %282 = vmatpush1.bf16.msra.mxu0 %v642_v7  ;;  %335 = vmatpush1.bf16.msra.mxu1 %v643_v8  ;;  %v205_v18 = vrot.slane %v200_v15, %v204_v13  ;;  %v213_v19 = vrot.slane %v200_v15, %v212_v14  ;;  %v209_v20 = vrot.slane %v200_v15, %v208_v16  ;;  %s456_s5 = sshll.u32 %s862_s4, 4  ;;  %s875_s9 = scalar_lea.hbm %s927_s3, %s576_s6  ;;  %s870_s5 = int_to_ptr.vmem [resolvable:$true] %s456_s5 }
  0x3c   : > { %v217_v21 = vrot.slane %v200_v15, %v216_v17  ;;  %s883_s16 = scalar_lea.sflag [#allocation4], %s177_s29  ;;  %s674_s10 = scalar_lea.vmem %s870_s5, 1024 }
  0x3d   : > { %p675_p6 = scmp.ne.s32.totalorder %s870_s5, %s674_s10  ;;  %p938_p9 = scmp.ne.s32.totalorder %s931_s22, 0 }
  0x3e   : > { %549 = vmatmul.mubr.msk.bf16.vlgmr.msra.gmra.mrb[0].mxu0 %vm272_vm0, %v644_v9  ;;  %551 = vmatmul.mubr.msk.bf16.vlgmr.msra.gmra.mrb[0].mxu1 %vm272_vm0, %v644_v9  ;;  %s746_s11 = smov [#allocation5]  }
  0x3f   : > { %321 = vmatprep.mubr.bf16.mxu0 %v745_v0  ;;  %374 = vmatprep.mubr.bf16.mxu1 %v745_v0  ;;  %p676_p10 = pnand %p675_p6, %p938_p9  ;;  %s678_s17 = sshll.u32 %s746_s11, 4  ;;  %s679_s17 = int_to_ptr.vmem [resolvable:$false] %s678_s17 }
  0x40   : > { %s680_s19 = scalar_lea.vmem %s679_s17, 2048  ;;  %p681_p2 = scmp.lt.s32.totalorder %s870_s5, %s679_s17 }
  0x41   : > { %p677_p12 = pneg %p676_p10  ;;  %p682_p3 = scmp.lt.s32.totalorder %s680_s19, %s674_s10 }
  0x43   : > { %p683_p4 = por %p682_p3, %p681_p2 }
  0x45   : > { %p684_p7 = pnand %p683_p4, %p677_p12 }
  0x46   : > { %550 = vmatmul.mubr.msk.bf16.gmra.mrb[4].mxu0 %vm272_vm0, %v645_v10  ;;  %552 = vmatmul.mubr.msk.bf16.gmra.mrb[4].mxu1 %vm272_vm0, %v645_v10 }
 0x111   : > { %v313_v22 = vpop.f32.mrb[0].mxu0  ;;  %v366_v23 = vpop.f32.mrb[0].mxu1 }
 0x112   : > { %v314_v24 = vadd.f32 %v313_v22, %v205_v18  ;;  %v367_v25 = vadd.f32 %v366_v23, %v213_v19  ;;  %v315_v26 = vpop.f32.mrb[1].mxu0  ;;  %v368_v27 = vpop.f32.mrb[1].mxu1 }
 0x113   : > { %v316_v28 = vadd.f32 %v315_v26, %v209_v20  ;;  %v369_v29 = vadd.f32 %v368_v27, %v217_v21  ;;  %v317_v30 = vpop.f32.mrb[2].mxu0  ;;  %v370_v31 = vpop.f32.mrb[2].mxu1 }
 0x114   : > { %v318_v32 = vadd.f32 %v317_v30, %v205_v18  ;;  %v371_v33 = vadd.f32 %v370_v31, %v213_v19  ;;  %v319_v34 = vpop.f32.mrb[3].mxu0  ;;  %v372_v35 = vpop.f32.mrb[3].mxu1 }
 0x115   : > { %v567_v36 = vpack.c.bf16 %v316_v28, %v314_v24  ;;  %v568_v37 = vpack.c.bf16 %v369_v29, %v367_v25  ;;  %v320_v38 = vadd.f32 %v319_v34, %v209_v20  ;;  %v373_v39 = vadd.f32 %v372_v35, %v217_v21 }
 0x117   : > { %433 = vst [vmem:[%s862_s4] sm:$0xff] %v567_v36  ;;  %434 = vst [vmem:[%s862_s4 + $0x8] sm:$0xff] %v568_v37  ;;  %v569_v40 = vpack.c.bf16 %v320_v38, %v318_v32  ;;  %v570_v41 = vpack.c.bf16 %v373_v39, %v371_v33 }
 0x119   : > { %435 = vst [vmem:[%s862_s4 + $0x10] sm:$0xff] %v569_v40  ;;  %436 = vst [vmem:[%s862_s4 + $0x18] sm:$0xff] %v570_v41  ;;  %v323_v42 = vpop.f32.mrb[4].mxu0  ;;  %v376_v43 = vpop.f32.mrb[4].mxu1 }
 0x11a   : > { %v324_v44 = vadd.f32 %v323_v42, %v205_v18  ;;  %v377_v45 = vadd.f32 %v376_v43, %v213_v19  ;;  %v325_v46 = vpop.f32.mrb[5].mxu0  ;;  %v378_v47 = vpop.f32.mrb[5].mxu1 }
 0x11b   : > { %v326_v48 = vadd.f32 %v325_v46, %v209_v20  ;;  %v379_v49 = vadd.f32 %v378_v47, %v217_v21  ;;  %v327_v50 = vpop.f32.mrb[6].mxu0  ;;  %v380_v51 = vpop.f32.mrb[6].mxu1 }
 0x11c   : > { %v328_v52 = vadd.f32 %v327_v50, %v205_v18  ;;  %v381_v53 = vadd.f32 %v380_v51, %v213_v19  ;;  %v329_v54 = vpop.f32.mrb[7].mxu0  ;;  %v382_v55 = vpop.f32.mrb[7].mxu1 }
 0x11d   : > { %v571_v56 = vpack.c.bf16 %v326_v48, %v324_v44  ;;  %v572_v57 = vpack.c.bf16 %v379_v49, %v377_v45  ;;  %v330_v58 = vadd.f32 %v329_v54, %v209_v20  ;;  %v383_v59 = vadd.f32 %v382_v55, %v217_v21 }
 0x11f   : > { %437 = vst [vmem:[%s862_s4 + $0x20] sm:$0xff] %v571_v56  ;;  %438 = vst [vmem:[%s862_s4 + $0x28] sm:$0xff] %v572_v57  ;;  %v573_v60 = vpack.c.bf16 %v330_v58, %v328_v52  ;;  %v574_v61 = vpack.c.bf16 %v383_v59, %v381_v53 }
 0x121   : > { %439 = vst [vmem:[%s862_s4 + $0x30] sm:$0xff] %v573_v60  ;;  %440 = vst [vmem:[%s862_s4 + $0x38] sm:$0xff] %v574_v61 }
 0x122   : > { %687 = shalt.err (!%p684_p7)
}
 0x123   : > { %s688_s20 = scalar_lea.hbm %s875_s9, 1024  ;;  %s692_s26 = scalar_lea.hbm %s927_s3, 2048 }
 0x124   : > { %p689_p8 = scmp.ne.s32.totalorder %s875_s9, %s688_s20  ;;  %p693_p1 = scmp.lt.u32.totalorder %s875_s9, %s927_s3 }
 0x125   : > { %p694_p0 = scmp.lt.u32.totalorder %s692_s26, %s688_s20  ;;  %p696_p6 = scmp.lt.u32.totalorder %s688_s20, %s875_s9 }
 0x126   : > { %p690_p11 = pnand %p689_p8, %p938_p9 }
 0x127   : > { %p695_p5 = por %p694_p0, %p693_p1 }
 0x128   : > { %p691_p13 = pneg %p690_p11 }
 0x129   : > { %p697_p10 = por %p696_p6, %p695_p5 }
 0x12b   : > { %p698_p12 = pnand %p697_p10, %p691_p13 }
 0x12d   : > { %701 = shalt.err (!%p698_p12)
}
 0x12e   : > { %s747_s29 = smov 256   ;;  %s748_s30 = smov 16  }
 0x12f   : > { %581 = dma.vmem_to_hbm [thread:$0]  (%p938_p9), %s870_s5, 1024, %s875_s9, %s883_s16, %s747_s29, %s747_s29, %s748_s30  }
 0x130 PF: > { %p593_p2 = scmp.ge.s32.totalorder %s740_s15, 2  ;;  %s471_s4 = sand.u32 1, %s728_s12  }
 0x131   : > { %p939_p3 = scmp.ne.s32.totalorder %s932_s23, 0  ;;  %s472_s6 = scalar_lea.sflag [#allocation4], %s471_s4 }
 0x133   : > { %p588_p4 = pnand %p593_p2, %p939_p3 }
 0x135   : > { %723 = dma.done.wait (!%p588_p4), %s472_s6, 1024  }
 0x136   : > { %725 = vsyncadd (!%p588_p4), %s472_s6, 4294966272  ;;  %p14_p7 = scmp.ge.s32.totalorder %s794_s18, 4   ;;  %s940_s12 = smov %s732_s13 }
 0x137   : > { %s941_s13 = smov %s736_s14  ;;  %s942_s14 = smov %s805_s21 }
 0x138   : > { %s943_s15 = smov %s794_s18  ;;  %16 = sbr.rel (!%p14_p7) target bundleno = 4 (0x4), region = 72 }
 0x13f   :  { %477 = vsyncpa [#allocation3], 1 }
 0x140   :  { %479 = vsyncpa [#allocation3 + $0x1], 1 }
 0x141   :  { %480 = vsyncpa [#allocation4], 1 }
 0x142   :  { %482 = vsyncpa [#allocation4 + $0x1], 1 }

</bundles_post_ra>
